<compile_context>
chip_gen: v7x
topology: tpu7x:2x2x1
jax: 0.10.0
libtpu: 0.0.40
codegen_flags: <defaults>
</compile_context>

<pallas_src>
import jax
import jax.numpy as jnp
from jax import lax
from jax.experimental import pallas as pl
from jax.experimental.pallas import tpu as pltpu


def _make_shift_conv_kernel(H, W, C_in, C_out, g, Bt, mxu_dtype):
    HW = H * W
    # Positive (modular) roll amounts; roll wrap-around lanes are exactly the
    # lanes the masks zero out, so roll+mask == padded depthwise-5x5 shift.
    sh_right = (-2) % HW        # y[i,j] = x[i, j+2]
    sh_left = 2                 # y[i,j] = x[i, j-2]
    sh_down = (-2 * W) % HW     # y[i,j] = x[i+2, j]
    sh_up = 2 * W               # y[i,j] = x[i-2, j]

    def kernel(x_ref, w_ref, b_ref, o_ref, y_ref):
        # x_ref : (Bt, C_in, HW)   Bt images, channels-first, flat spatial
        # w_ref : (C_out, C_in)    1x1 conv weight
        # b_ref : (C_out, 1)       1x1 conv bias
        # o_ref : (Bt, C_out, HW)
        # y_ref : VMEM scratch (C_in, Bt*HW) -- shifted activations with the
        #         batch folded onto lanes, feeding one wide MXU matmul.

        # One within-image flat-position iota yields all four shift masks.
        p = lax.broadcasted_iota(jnp.int32, (1, HW), 1)
        col = p % W
        m_r = col < (W - 2)       # source col j+2 in range
        m_l = col >= 2            # source col j-2 in range
        m_d = p < (HW - 2 * W)    # source row i+2 in range
        m_u = p >= (2 * W)        # source row i-2 in range

        for b in range(Bt):                       # static unroll, Bt is small
            xb = x_ref[b]                         # (C_in, HW)
            lanes = slice(b * HW, (b + 1) * HW)
            y_ref[0 * g:1 * g, lanes] = jnp.where(
                m_r, pltpu.roll(xb[0 * g:1 * g, :], sh_right, axis=1), 0.0)
            y_ref[1 * g:2 * g, lanes] = jnp.where(
                m_l, pltpu.roll(xb[1 * g:2 * g, :], sh_left, axis=1), 0.0)
            y_ref[2 * g:3 * g, lanes] = jnp.where(
                m_d, pltpu.roll(xb[2 * g:3 * g, :], sh_down, axis=1), 0.0)
            y_ref[3 * g:4 * g, lanes] = jnp.where(
                m_u, pltpu.roll(xb[3 * g:4 * g, :], sh_up, axis=1), 0.0)
            # group 4 (incl. any remainder channels): identity, matching the
            # PyTorch init `weight[4*g:, 0, 2, 2] = 1.0`.
            y_ref[4 * g:C_in, lanes] = xb[4 * g:C_in, :]

        y = y_ref[...]                            # (C_in, Bt*HW)
        w = w_ref[...]                            # (C_out, C_in)
        if mxu_dtype is not None:                 # bf16-at-the-dot (v6e/v7x)
            y = y.astype(mxu_dtype)
            w = w.astype(mxu_dtype)
        out = jnp.dot(w, y, preferred_element_type=jnp.float32)
        out = out + b_ref[...]                    # (C_out, 1) bias broadcast

        for b in range(Bt):                       # lane-dense unmasked stores
            o_ref[b] = out[:, b * HW:(b + 1) * HW].astype(o_ref.dtype)

    return kernel


def _choose_bt(B, HW, C_in, C_out, itemsize,
               target_lanes=1024, vmem_budget_bytes=16 << 20):
    """Images folded per grid step: widen the matmul N toward ~target_lanes
    while keeping the (double-buffered) per-step footprint under a VMEM
    budget that is safe on every generation (v7x has 64 MiB / 32 MiB scoped)."""
    bt = min(B, max(1, target_lanes // HW))
    # x (2 buffers) + y scratch + out (2 buffers), per image, in bytes.
    per_image = HW * itemsize * (3 * C_in + 2 * C_out)
    bt = max(1, min(bt, vmem_budget_bytes // max(per_image, 1)))
    while B % bt:                                 # rectangular grid, no tail
        bt -= 1
    return bt


def shift_conv2d1(x_nchw, w1x1, bias, *, mxu_dtype=None):
    """ShiftConv2d1 forward.

    x_nchw: (B, C_in, H, W); w1x1: (C_out, C_in); bias: (C_out,).
    Set mxu_dtype=jnp.bfloat16 on v6e/v7x to run the 1x1-conv matmul on the
    bf16-native MXU (f32 accumulation; inputs/outputs stay in x's dtype).
    """
    B, C_in, H, W = x_nchw.shape
    C_out = w1x1.shape[0]
    g = C_in // 5
    assert g >= 1, "inp_channels must be >= n_div (5)"
    HW = H * W
    itemsize = jnp.dtype(x_nchw.dtype).itemsize
    Bt = _choose_bt(B, HW, C_in, C_out, itemsize)

    x_flat = x_nchw.reshape(B, C_in, HW)          # free: contiguous collapse
    b2 = bias.reshape(C_out, 1)

    kernel = _make_shift_conv_kernel(H, W, C_in, C_out, g, Bt, mxu_dtype)
    cost = pl.CostEstimate(
        flops=2 * B * HW * C_in * C_out,
        transcendentals=0,
        bytes_accessed=(x_flat.size + w1x1.size + bias.size + B * C_out * HW)
        * itemsize,
    )

    # TODO(synk): for production H*W, tile the lane axis with a 2*W halo for
    # the vertical shifts instead of taking whole images per block.
    out_flat = pl.pallas_call(
        kernel,
        out_shape=jax.ShapeDtypeStruct((B, C_out, HW), x_nchw.dtype),
        grid=(B // Bt,),
        in_specs=[
            pl.BlockSpec((Bt, C_in, HW), lambda i: (i, 0, 0)),
            pl.BlockSpec((C_out, C_in), lambda i: (0, 0)),
            pl.BlockSpec((C_out, 1), lambda i: (0, 0)),
        ],
        out_specs=pl.BlockSpec((Bt, C_out, HW), lambda i: (i, 0, 0)),
        scratch_shapes=[pltpu.VMEM((C_in, Bt * HW), x_nchw.dtype)],
        compiler_params=pltpu.CompilerParams(
            dimension_semantics=("parallel",)),
        cost_estimate=cost,
    )(x_flat, w1x1, b2)

    return out_flat.reshape(B, C_out, H, W)       # free: contiguous expand


def reference_nchw(x, w1x1, bias):
    """Pure-JAX reference mirroring the PyTorch forward (for verification)."""
    B, C, H, W = x.shape
    g = C // 5
    xp = jnp.pad(x, ((0, 0), (0, 0), (2, 2), (2, 2)))
    y = jnp.concatenate([
        xp[:, 0 * g:1 * g, 2:2 + H, 4:4 + W],   # x[i, j+2]
        xp[:, 1 * g:2 * g, 2:2 + H, 0:0 + W],   # x[i, j-2]
        xp[:, 2 * g:3 * g, 4:4 + H, 2:2 + W],   # x[i+2, j]
        xp[:, 3 * g:4 * g, 0:0 + H, 2:2 + W],   # x[i-2, j]
        x[:, 4 * g:, :, :],                     # identity (incl. remainder)
    ], axis=1)
    return jnp.einsum('bchw,oc->bohw', y, w1x1) + bias[None, :, None, None]


if __name__ == "__main__":
    root_key = jax.random.PRNGKey(0)

    def run_case(B, C_in, C_out, H, W, mxu_dtype, tol):
        kx, kw, kb = jax.random.split(
            jax.random.fold_in(root_key, B * 1000 + C_in), 3)
        x = jax.random.normal(kx, (B, C_in, H, W), dtype=jnp.float32)
        # Deterministic synthetic init of the conv1x1 parameters.
        w1x1 = jax.random.normal(kw, (C_out, C_in), dtype=jnp.float32) * 0.1
        bias = jax.random.normal(kb, (C_out,), dtype=jnp.float32) * 0.1
        out = jax.block_until_ready(
            shift_conv2d1(x, w1x1, bias, mxu_dtype=mxu_dtype))
        ref = jax.block_until_ready(reference_nchw(x, w1x1, bias))
        assert out.shape == ref.shape, (out.shape, ref.shape)
        assert jnp.allclose(out, ref, atol=tol, rtol=tol), (
            f"mismatch vs reference (B={B}, C_in={C_in}, mxu_dtype={mxu_dtype})")

    # Primary small case: whole batch folded into one grid step (N = 512 lanes).
    run_case(B=2, C_in=10, C_out=8, H=16, W=16, mxu_dtype=None, tol=1e-5)
    # Remainder channels (C_in % 5 != 0 -> identity per the PyTorch init) and a
    # multi-step grid (B=8 -> Bt=4 -> 2 pipelined "parallel" steps).
    run_case(B=8, C_in=11, C_out=8, H=16, W=16, mxu_dtype=None, tol=1e-5)
    # bf16-at-the-dot path for the bf16-native MXU on v6e/v7x.
    run_case(B=2, C_in=10, C_out=8, H=16, W=16, mxu_dtype=jnp.bfloat16, tol=1e-1)

    print("KERNEL_OK")
</pallas_src>

<mosaic_0001>
module attributes {stable_mosaic.version = 11 : i64} {
  func.func @kernel(%arg0: i32, %arg1: memref<2x10x256xf32, #tpu.memory_space<vmem>>, %arg2: memref<8x10xf32, #tpu.memory_space<vmem>>, %arg3: memref<8x1xf32, #tpu.memory_space<vmem>>, %arg4: memref<2x8x256xf32, #tpu.memory_space<vmem>>, %arg5: memref<10x512xf32, #tpu.memory_space<vmem>>) attributes {dimension_semantics = [#tpu.dimension_semantics<parallel>], iteration_bounds = array<i64: 1>, scalar_prefetch = 0 : i64, scratch_operands = 1 : i64, tpu.core_type = #tpu.core_type<tc>, window_params = [{transform_indices = @transform_0, window_bounds = array<i64: 2, 10, 256>}, {pipeline_mode = #tpu.pipeline_mode<synchronous>, transform_indices = @transform_1, window_bounds = array<i64: 8, 10>}, {pipeline_mode = #tpu.pipeline_mode<synchronous>, transform_indices = @transform_2, window_bounds = array<i64: 8, 1>}, {transform_indices = @transform_3, window_bounds = array<i64: 2, 8, 256>}]} {
    %0 = tpu.iota {dimensions = array<i32: 1>} : vector<1x256xi32>
    %c16_i32 = arith.constant 16 : i32
    %c0_i32 = arith.constant 0 : i32
    %1 = arith.cmpi eq, %c16_i32, %c0_i32 : i32
    %c1_i32 = arith.constant 1 : i32
    %2 = arith.select %1, %c1_i32, %c16_i32 : i32
    %3 = vector.broadcast %2 : i32 to vector<1x256xi32>
    %4 = arith.remsi %0, %3 : vector<1x256xi32>
    %c0_i32_0 = arith.constant 0 : i32
    %5 = vector.broadcast %c0_i32_0 : i32 to vector<1x256xi32>
    %6 = arith.cmpi ne, %4, %5 : vector<1x256xi32>
    %c0_i32_1 = arith.constant 0 : i32
    %7 = vector.broadcast %c0_i32_1 : i32 to vector<1x256xi32>
    %8 = arith.cmpi slt, %4, %7 : vector<1x256xi32>
    %c0_i32_2 = arith.constant 0 : i32
    %9 = arith.cmpi slt, %2, %c0_i32_2 : i32
    %10 = vector.broadcast %9 : i1 to vector<1x256xi1>
    %11 = vector.broadcast %10 : vector<1x256xi1> to vector<1x256xi1>
    %12 = arith.xori %8, %11 : vector<1x256xi1>
    %13 = arith.andi %12, %6 : vector<1x256xi1>
    %14 = vector.broadcast %2 : i32 to vector<1x256xi32>
    %15 = arith.addi %4, %14 : vector<1x256xi32>
    %16 = arith.select %13, %15, %4 : vector<1x256xi1>, vector<1x256xi32>
    %c14_i32 = arith.constant 14 : i32
    %17 = vector.broadcast %c14_i32 : i32 to vector<1x256xi32>
    %18 = arith.cmpi slt, %16, %17 : vector<1x256xi32>
    %c2_i32 = arith.constant 2 : i32
    %19 = vector.broadcast %c2_i32 : i32 to vector<1x256xi32>
    %20 = arith.cmpi sge, %16, %19 : vector<1x256xi32>
    %c224_i32 = arith.constant 224 : i32
    %21 = vector.broadcast %c224_i32 : i32 to vector<1x256xi32>
    %22 = arith.cmpi slt, %0, %21 : vector<1x256xi32>
    %c32_i32 = arith.constant 32 : i32
    %23 = vector.broadcast %c32_i32 : i32 to vector<1x256xi32>
    %24 = arith.cmpi sge, %0, %23 : vector<1x256xi32>
    %c0 = arith.constant 0 : index
    %c0_3 = arith.constant 0 : index
    %c0_4 = arith.constant 0 : index
    %25 = vector.load %arg1[%c0, %c0_3, %c0_4] : memref<2x10x256xf32, #tpu.memory_space<vmem>>, vector<1x10x256xf32>
    %26 = vector.shape_cast %25 : vector<1x10x256xf32> to vector<10x256xf32>
    %27 = vector.extract_strided_slice %26 {offsets = [0, 0], sizes = [2, 256], strides = [1, 1]} : vector<10x256xf32> to vector<2x256xf32>
    %c254_i32 = arith.constant 254 : i32
    %28 = tpu.dynamic_rotate %27 by %c254_i32 dim 1 : vector<2x256xf32>, i32 -> vector<2x256xf32>
    %cst = arith.constant 0.000000e+00 : f32
    %29 = vector.shape_cast %18 : vector<1x256xi1> to vector<1x256xi1>
    %30 = vector.broadcast %29 : vector<1x256xi1> to vector<2x256xi1>
    %31 = vector.broadcast %cst : f32 to vector<2x256xf32>
    %32 = arith.select %30, %28, %31 : vector<2x256xi1>, vector<2x256xf32>
    %c0_5 = arith.constant 0 : index
    %c0_6 = arith.constant 0 : index
    %33 = vector.load %arg5[%c0_5, %c0_6] : memref<10x512xf32, #tpu.memory_space<vmem>>, vector<2x256xf32>
    tpu.vector_store %arg5[%c0_5, %c0_6], %32 {strides = array<i32>} : memref<10x512xf32, #tpu.memory_space<vmem>>, vector<2x256xf32>,
    %34 = vector.extract_strided_slice %26 {offsets = [2, 0], sizes = [2, 256], strides = [1, 1]} : vector<10x256xf32> to vector<2x256xf32>
    %c2_i32_7 = arith.constant 2 : i32
    %35 = tpu.dynamic_rotate %34 by %c2_i32_7 dim 1 : vector<2x256xf32>, i32 -> vector<2x256xf32>
    %cst_8 = arith.constant 0.000000e+00 : f32
    %36 = vector.shape_cast %20 : vector<1x256xi1> to vector<1x256xi1>
    %37 = vector.broadcast %36 : vector<1x256xi1> to vector<2x256xi1>
    %38 = vector.broadcast %cst_8 : f32 to vector<2x256xf32>
    %39 = arith.select %37, %35, %38 : vector<2x256xi1>, vector<2x256xf32>
    %c2 = arith.constant 2 : index
    %c0_9 = arith.constant 0 : index
    %40 = vector.load %arg5[%c2, %c0_9] : memref<10x512xf32, #tpu.memory_space<vmem>>, vector<2x256xf32>
    tpu.vector_store %arg5[%c2, %c0_9], %39 {strides = array<i32>} : memref<10x512xf32, #tpu.memory_space<vmem>>, vector<2x256xf32>,
    %41 = vector.extract_strided_slice %26 {offsets = [4, 0], sizes = [2, 256], strides = [1, 1]} : vector<10x256xf32> to vector<2x256xf32>
    %c224_i32_10 = arith.constant 224 : i32
    %42 = tpu.dynamic_rotate %41 by %c224_i32_10 dim 1 : vector<2x256xf32>, i32 -> vector<2x256xf32>
    %cst_11 = arith.constant 0.000000e+00 : f32
    %43 = vector.shape_cast %22 : vector<1x256xi1> to vector<1x256xi1>
    %44 = vector.broadcast %43 : vector<1x256xi1> to vector<2x256xi1>
    %45 = vector.broadcast %cst_11 : f32 to vector<2x256xf32>
    %46 = arith.select %44, %42, %45 : vector<2x256xi1>, vector<2x256xf32>
    %c4 = arith.constant 4 : index
    %c0_12 = arith.constant 0 : index
    %47 = vector.load %arg5[%c4, %c0_12] : memref<10x512xf32, #tpu.memory_space<vmem>>, vector<2x256xf32>
    tpu.vector_store %arg5[%c4, %c0_12], %46 {strides = array<i32>} : memref<10x512xf32, #tpu.memory_space<vmem>>, vector<2x256xf32>,
    %48 = vector.extract_strided_slice %26 {offsets = [6, 0], sizes = [2, 256], strides = [1, 1]} : vector<10x256xf32> to vector<2x256xf32>
    %c32_i32_13 = arith.constant 32 : i32
    %49 = tpu.dynamic_rotate %48 by %c32_i32_13 dim 1 : vector<2x256xf32>, i32 -> vector<2x256xf32>
    %cst_14 = arith.constant 0.000000e+00 : f32
    %50 = vector.shape_cast %24 : vector<1x256xi1> to vector<1x256xi1>
    %51 = vector.broadcast %50 : vector<1x256xi1> to vector<2x256xi1>
    %52 = vector.broadcast %cst_14 : f32 to vector<2x256xf32>
    %53 = arith.select %51, %49, %52 : vector<2x256xi1>, vector<2x256xf32>
    %c6 = arith.constant 6 : index
    %c0_15 = arith.constant 0 : index
    %54 = vector.load %arg5[%c6, %c0_15] : memref<10x512xf32, #tpu.memory_space<vmem>>, vector<2x256xf32>
    tpu.vector_store %arg5[%c6, %c0_15], %53 {strides = array<i32>} : memref<10x512xf32, #tpu.memory_space<vmem>>, vector<2x256xf32>,
    %55 = vector.extract_strided_slice %26 {offsets = [8, 0], sizes = [2, 256], strides = [1, 1]} : vector<10x256xf32> to vector<2x256xf32>
    %c8 = arith.constant 8 : index
    %c0_16 = arith.constant 0 : index
    %56 = vector.load %arg5[%c8, %c0_16] : memref<10x512xf32, #tpu.memory_space<vmem>>, vector<2x256xf32>
    tpu.vector_store %arg5[%c8, %c0_16], %55 {strides = array<i32>} : memref<10x512xf32, #tpu.memory_space<vmem>>, vector<2x256xf32>,
    %c1 = arith.constant 1 : index
    %c0_17 = arith.constant 0 : index
    %c0_18 = arith.constant 0 : index
    %57 = vector.load %arg1[%c1, %c0_17, %c0_18] : memref<2x10x256xf32, #tpu.memory_space<vmem>>, vector<1x10x256xf32>
    %58 = vector.shape_cast %57 : vector<1x10x256xf32> to vector<10x256xf32>
    %59 = vector.extract_strided_slice %58 {offsets = [0, 0], sizes = [2, 256], strides = [1, 1]} : vector<10x256xf32> to vector<2x256xf32>
    %c254_i32_19 = arith.constant 254 : i32
    %60 = tpu.dynamic_rotate %59 by %c254_i32_19 dim 1 : vector<2x256xf32>, i32 -> vector<2x256xf32>
    %cst_20 = arith.constant 0.000000e+00 : f32
    %61 = vector.shape_cast %18 : vector<1x256xi1> to vector<1x256xi1>
    %62 = vector.broadcast %61 : vector<1x256xi1> to vector<2x256xi1>
    %63 = vector.broadcast %cst_20 : f32 to vector<2x256xf32>
    %64 = arith.select %62, %60, %63 : vector<2x256xi1>, vector<2x256xf32>
    %c0_21 = arith.constant 0 : index
    %c256 = arith.constant 256 : index
    %65 = vector.load %arg5[%c0_21, %c256] : memref<10x512xf32, #tpu.memory_space<vmem>>, vector<2x256xf32>
    tpu.vector_store %arg5[%c0_21, %c256], %64 {strides = array<i32>} : memref<10x512xf32, #tpu.memory_space<vmem>>, vector<2x256xf32>,
    %66 = vector.extract_strided_slice %58 {offsets = [2, 0], sizes = [2, 256], strides = [1, 1]} : vector<10x256xf32> to vector<2x256xf32>
    %c2_i32_22 = arith.constant 2 : i32
    %67 = tpu.dynamic_rotate %66 by %c2_i32_22 dim 1 : vector<2x256xf32>, i32 -> vector<2x256xf32>
    %cst_23 = arith.constant 0.000000e+00 : f32
    %68 = vector.shape_cast %20 : vector<1x256xi1> to vector<1x256xi1>
    %69 = vector.broadcast %68 : vector<1x256xi1> to vector<2x256xi1>
    %70 = vector.broadcast %cst_23 : f32 to vector<2x256xf32>
    %71 = arith.select %69, %67, %70 : vector<2x256xi1>, vector<2x256xf32>
    %c2_24 = arith.constant 2 : index
    %c256_25 = arith.constant 256 : index
    %72 = vector.load %arg5[%c2_24, %c256_25] : memref<10x512xf32, #tpu.memory_space<vmem>>, vector<2x256xf32>
    tpu.vector_store %arg5[%c2_24, %c256_25], %71 {strides = array<i32>} : memref<10x512xf32, #tpu.memory_space<vmem>>, vector<2x256xf32>,
    %73 = vector.extract_strided_slice %58 {offsets = [4, 0], sizes = [2, 256], strides = [1, 1]} : vector<10x256xf32> to vector<2x256xf32>
    %c224_i32_26 = arith.constant 224 : i32
    %74 = tpu.dynamic_rotate %73 by %c224_i32_26 dim 1 : vector<2x256xf32>, i32 -> vector<2x256xf32>
    %cst_27 = arith.constant 0.000000e+00 : f32
    %75 = vector.shape_cast %22 : vector<1x256xi1> to vector<1x256xi1>
    %76 = vector.broadcast %75 : vector<1x256xi1> to vector<2x256xi1>
    %77 = vector.broadcast %cst_27 : f32 to vector<2x256xf32>
    %78 = arith.select %76, %74, %77 : vector<2x256xi1>, vector<2x256xf32>
    %c4_28 = arith.constant 4 : index
    %c256_29 = arith.constant 256 : index
    %79 = vector.load %arg5[%c4_28, %c256_29] : memref<10x512xf32, #tpu.memory_space<vmem>>, vector<2x256xf32>
    tpu.vector_store %arg5[%c4_28, %c256_29], %78 {strides = array<i32>} : memref<10x512xf32, #tpu.memory_space<vmem>>, vector<2x256xf32>,
    %80 = vector.extract_strided_slice %58 {offsets = [6, 0], sizes = [2, 256], strides = [1, 1]} : vector<10x256xf32> to vector<2x256xf32>
    %c32_i32_30 = arith.constant 32 : i32
    %81 = tpu.dynamic_rotate %80 by %c32_i32_30 dim 1 : vector<2x256xf32>, i32 -> vector<2x256xf32>
    %cst_31 = arith.constant 0.000000e+00 : f32
    %82 = vector.shape_cast %24 : vector<1x256xi1> to vector<1x256xi1>
    %83 = vector.broadcast %82 : vector<1x256xi1> to vector<2x256xi1>
    %84 = vector.broadcast %cst_31 : f32 to vector<2x256xf32>
    %85 = arith.select %83, %81, %84 : vector<2x256xi1>, vector<2x256xf32>
    %c6_32 = arith.constant 6 : index
    %c256_33 = arith.constant 256 : index
    %86 = vector.load %arg5[%c6_32, %c256_33] : memref<10x512xf32, #tpu.memory_space<vmem>>, vector<2x256xf32>
    tpu.vector_store %arg5[%c6_32, %c256_33], %85 {strides = array<i32>} : memref<10x512xf32, #tpu.memory_space<vmem>>, vector<2x256xf32>,
    %87 = vector.extract_strided_slice %58 {offsets = [8, 0], sizes = [2, 256], strides = [1, 1]} : vector<10x256xf32> to vector<2x256xf32>
    %c8_34 = arith.constant 8 : index
    %c256_35 = arith.constant 256 : index
    %88 = vector.load %arg5[%c8_34, %c256_35] : memref<10x512xf32, #tpu.memory_space<vmem>>, vector<2x256xf32>
    tpu.vector_store %arg5[%c8_34, %c256_35], %87 {strides = array<i32>} : memref<10x512xf32, #tpu.memory_space<vmem>>, vector<2x256xf32>,
    %c0_36 = arith.constant 0 : index
    %c0_37 = arith.constant 0 : index
    %89 = vector.load %arg5[%c0_36, %c0_37] : memref<10x512xf32, #tpu.memory_space<vmem>>, vector<10x512xf32>
    %c0_38 = arith.constant 0 : index
    %c0_39 = arith.constant 0 : index
    %90 = vector.load %arg2[%c0_38, %c0_39] : memref<8x10xf32, #tpu.memory_space<vmem>>, vector<8x10xf32>
    %cst_40 = arith.constant dense<0.000000e+00> : vector<8x512xf32>
    %91 = tpu.matmul %90, %89, %cst_40 {dimension_numbers = #tpu.dot_dimension_numbers<[1], [0], [0], [1], [0, 0, 1, 1], [], []>} : vector<8x10xf32>, vector<10x512xf32>, vector<8x512xf32> -> vector<8x512xf32>
    %c0_41 = arith.constant 0 : index
    %c0_42 = arith.constant 0 : index
    %92 = vector.load %arg3[%c0_41, %c0_42] : memref<8x1xf32, #tpu.memory_space<vmem>>, vector<8x1xf32>
    %93 = vector.broadcast %92 : vector<8x1xf32> to vector<8x512xf32>
    %94 = arith.addf %91, %93 : vector<8x512xf32>
    %95 = vector.extract_strided_slice %94 {offsets = [0, 0], sizes = [8, 256], strides = [1, 1]} : vector<8x512xf32> to vector<8x256xf32>
    %c0_43 = arith.constant 0 : index
    %c0_44 = arith.constant 0 : index
    %c0_45 = arith.constant 0 : index
    %96 = vector.load %arg4[%c0_43, %c0_44, %c0_45] : memref<2x8x256xf32, #tpu.memory_space<vmem>>, vector<1x8x256xf32>
    %97 = vector.shape_cast %96 : vector<1x8x256xf32> to vector<8x256xf32>
    %98 = vector.shape_cast %95 : vector<8x256xf32> to vector<1x8x256xf32>
    tpu.vector_store %arg4[%c0_43, %c0_44, %c0_45], %98 {strides = array<i32>} : memref<2x8x256xf32, #tpu.memory_space<vmem>>, vector<1x8x256xf32>,
    %99 = vector.extract_strided_slice %94 {offsets = [0, 256], sizes = [8, 256], strides = [1, 1]} : vector<8x512xf32> to vector<8x256xf32>
    %c1_46 = arith.constant 1 : index
    %c0_47 = arith.constant 0 : index
    %c0_48 = arith.constant 0 : index
    %100 = vector.load %arg4[%c1_46, %c0_47, %c0_48] : memref<2x8x256xf32, #tpu.memory_space<vmem>>, vector<1x8x256xf32>
    %101 = vector.shape_cast %100 : vector<1x8x256xf32> to vector<8x256xf32>
    %102 = vector.shape_cast %99 : vector<8x256xf32> to vector<1x8x256xf32>
    tpu.vector_store %arg4[%c1_46, %c0_47, %c0_48], %102 {strides = array<i32>} : memref<2x8x256xf32, #tpu.memory_space<vmem>>, vector<1x8x256xf32>,
    return
  }
  func.func @transform_0(%arg0: i32) -> (i32, i32, i32) {
    %c0_i32 = arith.constant 0 : i32
    %c0_i32_0 = arith.constant 0 : i32
    %c0_i32_1 = arith.constant 0 : i32
    return %arg0, %c0_i32, %c0_i32_0 : i32, i32, i32
  }
  func.func @transform_1(%arg0: i32) -> (i32, i32) {
    %c0_i32 = arith.constant 0 : i32
    %c0_i32_0 = arith.constant 0 : i32
    %c0_i32_1 = arith.constant 0 : i32
    return %c0_i32, %c0_i32_0 : i32, i32
  }
  func.func @transform_2(%arg0: i32) -> (i32, i32) {
    %c0_i32 = arith.constant 0 : i32
    %c0_i32_0 = arith.constant 0 : i32
    %c0_i32_1 = arith.constant 0 : i32
    return %c0_i32, %c0_i32_0 : i32, i32
  }
  func.func @transform_3(%arg0: i32) -> (i32, i32, i32) {
    %c0_i32 = arith.constant 0 : i32
    %c0_i32_0 = arith.constant 0 : i32
    %c0_i32_1 = arith.constant 0 : i32
    return %arg0, %c0_i32, %c0_i32_0 : i32, i32, i32
  }
}

</mosaic_0001>

<bundles_post_ra>
// kernel: tpu_custom_call.1
= control target key start
LH: loop header
LB: loop body
LE: loop exit
PB: predicated region body
PF: predicated region fallthrough
CT: control target
= control target key end

     0   :  { %s479_s16 = smov 96   ;;  %s480_s17 = smov 2   ;;  %s656_s0 = inlined_call_operand.vmem [shape: f32[2,10,256], index: 0, kind: input, shape index: {}]   ;;  %s657_s1 = inlined_call_operand.vmem [shape: f32[8,10], index: 1, kind: input, shape index: {}]   ;;  %s658_s2 = inlined_call_operand.vmem [shape: f32[8,1], index: 2, kind: input, shape index: {}]   ;;  %s659_s3 = inlined_call_operand.hbm [shape: f32[2,8,256], index: 3, kind: output, shape index: {}]  }
   0x1   :  { %v50_v0 = vld [vmem:[%s656_s0] sm:$0xff]  ;;  %v51_v1 = vld [vmem:[%s656_s0 + $0x8] sm:$0xff] }
   0x2   :  { %v96_v2 = vrot.slane %v50_v0, 4  ;;  %v71_v3 = vrot.slane %v50_v0, 2  ;;  %v97_v4 = vrot.slane %v51_v1, 4  ;;  %v72_v5 = vrot.slane %v51_v1, 2 }
   0x4   :  { %100 = vrot.lane.b32.xlu1 %v96_v2, %s479_s16  ;;  %75 = vrot.lane.b32.xlu0 %v71_v3, %s480_s17 }
   0x5   :  { %8 = vsyncpa [#allocation4], 0  ;;  %v423_v6 = vld [vmem:[%s656_s0 + $0x28] sm:$0xff]  ;;  %v422_v7 = vld [vmem:[%s656_s0 + $0x20] sm:$0xff]  ;;  %v122_v12 = vrot.slane %v51_v1, 6  ;;  %v121_v13 = vrot.slane %v50_v0, 6  ;;  %v15_v23 = vlaneseq }
   0x6   :  { %v166_v8 = vrot.slane %v423_v6, 2  ;;  %v165_v9 = vrot.slane %v422_v7, 2  ;;  %v186_v10 = vrot.slane %v423_v6, 4  ;;  %v185_v11 = vrot.slane %v422_v7, 4  ;;  %v53_v14 = vld [vmem:[%s656_s0 + $0x18] sm:$0x3] }
   0x7   :  { %v52_v15 = vld [vmem:[%s656_s0 + $0x10] sm:$0x3]  ;;  %147 = vst [vmem:[#allocation2 + $0x28] sm:$0x3] %v53_v14  ;;  %s481_s26 = smov 32   ;;  %v206_v16 = vrot.slane %v423_v6, 6 }
   0x8   :  { %102 = vrot.lane.b32.xlu1 %v97_v4, %s479_s16  ;;  %77 = vrot.lane.b32.xlu0 %v72_v5, %s480_s17  ;;  %146 = vst [vmem:[#allocation2 + $0x20] sm:$0x3] %v52_v15  ;;  %v205_v17 = vrot.slane %v422_v7, 6  ;;  %v425_v18 = vld [vmem:[%s656_s0 + $0x38] sm:$0x3]  ;;  %s482_s4 = smov 126  }
   0x9   :  { %v424_v19 = vld [vmem:[%s656_s0 + $0x30] sm:$0x3]  ;;  %226 = vst [vmem:[#allocation2 + $0x38] sm:$0x3] %v425_v18  ;;  %v483_v20 = vmov 0.0   ;;  %v236_v21 = vld [vmem:[%s658_s2] sm:$0xff] }
   0xa   :  { %225 = vst [vmem:[#allocation2 + $0x30] sm:$0x3] %v424_v19  ;;  %323 = vmatprep.mubr.f32.mxu0 %v483_v20  ;;  %394 = vmatprep.mubr.f32.mxu1 %v483_v20  ;;  %v484_v22 = vmov 0   ;;  %v536_v24 = vand.u32 127, %v15_v23  ;;  %vm246_vm10 = vcmask 1041408   ;;  %vm485_vm11 = vmmov 1  }
   0xb   :  { %454 = vset.pattern.permute.xlu0 %v484_v22  ;;  %vm629_vm12 = vmpackc.low %vm246_vm10, %vm485_vm11  ;;  %vm242_vm13 = vcmask 80896   ;;  %s486_s7 = smov [#allocation3]  }
   0xc   :  { %171 = vrot.lane.b32.xlu1 %v166_v8, %s480_s17  ;;  %169 = vrot.lane.b32.xlu0 %v165_v9, %s480_s17  ;;  %v539_v25 = vadd.s32 128, %v536_v24  ;;  %v22_v26 = vand.u32 15, %v536_v24  ;;  %vm104_vm0 = vcmp.lt.s32.totalorder %v536_v24, 96  ;;  %vm79_vm1 = vcmp.lt.s32.totalorder %v536_v24, 2  ;;  %s411_s8 = sshll.u32 %s486_s7, 4  ;;  %s412_s8 = int_to_ptr.vmem [resolvable:$true] %s411_s8 }
   0xd   :  { %vm129_vm5 = vcmp.lt.s32.totalorder %v536_v24, 32  ;;  %vm48_vm6 = vcmp.ge.s32.totalorder %v536_v24, 32  ;;  %vm58_vm7 = vcmp.lt.s32.totalorder %v536_v24, 126  ;;  %p460_p1 = scmp.lt.s32.totalorder %s412_s8, %s412_s8 }
   0xe   :  { %v29_v27 = vand.u32 15, %v539_v25  ;;  %vm47_vm2 = vcmp.lt.s32.totalorder %v539_v25, 224  ;;  %vm548_vm3 = vcmp.ge.s32.totalorder %v22_v26, 2  ;;  %vm603_vm8 = vcmp.lt.s32.totalorder %v22_v26, 14  ;;  %v232_v25 = vld [vmem:[#allocation2 + $0x28] sm:$0x3] }
   0xf   :  { %v231_v26 = vld [vmem:[#allocation2 + $0x20] sm:$0x3] }
  0x10   :  { %191 = vrot.lane.b32.xlu1 %v186_v10, %s479_s16  ;;  %189 = vrot.lane.b32.xlu0 %v185_v11, %s479_s16  ;;  %vm554_vm4 = vcmp.ge.s32.totalorder %v29_v27, 2  ;;  %vm609_vm9 = vcmp.lt.s32.totalorder %v29_v27, 14  ;;  %v234_v31 = vld [vmem:[#allocation2 + $0x38] sm:$0x3] }
  0x14   :  { %127 = vrot.lane.b32.xlu1 %v122_v12, %s481_s26  ;;  %125 = vrot.lane.b32.xlu0 %v121_v13, %s481_s26 }
  0x18   :  { %211 = vrot.lane.b32.xlu1 %v206_v16, %s481_s26  ;;  %209 = vrot.lane.b32.xlu0 %v205_v17, %s481_s26 }
  0x1c   :  { %56 = vrot.lane.b32.xlu1 %v51_v1, %s482_s4  ;;  %54 = vrot.lane.b32.xlu0 %v50_v0, %s482_s4 }
  0x20   :  { %155 = vrot.lane.b32.xlu1 %v423_v6, %s482_s4  ;;  %153 = vrot.lane.b32.xlu0 %v422_v7, %s482_s4 }
  0x24   :  { %239 = vperm.xlu0 %454, %v236_v21  }
  0x76   :  { %v101_v28 = vpop.permute.xlu1 %100  ;;  %v76_v29 = vpop.permute.xlu0 %75 }
  0x7a   :  { %v103_v32 = vpop.permute.xlu1 %102  ;;  %v78_v33 = vpop.permute.xlu0 %77 }
  0x7b   :  { %v105_v34 = vsel %vm104_vm0, %v101_v28, %v103_v32  ;;  %v106_v35 = vsel %vm104_vm0, %v103_v32, %v101_v28  ;;  %v80_v36 = vsel %vm79_vm1, %v76_v29, %v78_v33  ;;  %v81_v37 = vsel %vm79_vm1, %v78_v33, %v76_v29  ;;  %v233_v32 = vld [vmem:[#allocation2 + $0x30] sm:$0x3] }
  0x7c   :  { %v112_v38 = vsel %vm47_vm2, %v106_v35, 0.0  ;;  %v115_v39 = vrot.slane %v105_v34, 4  ;;  %v86_v40 = vsel %vm548_vm3, %v81_v37, 0.0  ;;  %v87_v41 = vsel %vm554_vm4, %v80_v36, 0.0  ;;  %v235_v35 = vld [vmem:[%s657_s1] sm:$0xff]  ;;  %s455_s1 = scalar_lea.vmem %s412_s8, 512 }
  0x7d   :  { %v116_v42 = vrot.slane %v112_v38, 4  ;;  %v90_v43 = vrot.slane %v86_v40, 6  ;;  %v91_v44 = vrot.slane %v87_v41, 6  ;;  %p456_p0 = scmp.ne.s32.totalorder %s412_s8, %s455_s1  ;;  %p461_p2 = scmp.lt.s32.totalorder %s455_s1, %s455_s1 }
  0x7e   :  { %119 = vst [vmem:[#allocation2] sm:$0x30] %v115_v39  ;;  %v172_v45 = vpop.permute.xlu1 %171  ;;  %v170_v46 = vpop.permute.xlu0 %169 }
  0x7f   :  { %120 = vst [vmem:[#allocation2 + $0x8] sm:$0x30] %v116_v42  ;;  %94 = vst [vmem:[#allocation2] sm:$0xc] %v90_v43  ;;  %v173_v47 = vsel %vm79_vm1, %v170_v46, %v172_v45  ;;  %v174_v48 = vsel %vm79_vm1, %v172_v45, %v170_v46  ;;  %p462_p3 = por %p461_p2, %p460_p1 }
  0x80   :  { %95 = vst [vmem:[#allocation2 + $0x8] sm:$0xc] %v91_v44  ;;  %v175_v49 = vsel %vm548_vm3, %v174_v48, 0.0  ;;  %v176_v50 = vsel %vm554_vm4, %v173_v47, 0.0 }
  0x81   :  { %v179_v51 = vrot.slane %v175_v49, 6  ;;  %v180_v52 = vrot.slane %v176_v50, 6  ;;  %p463_p4 = pnand %p462_p3, %p456_p0 }
  0x82   :  { %v192_v53 = vpop.permute.xlu1 %191  ;;  %v190_v54 = vpop.permute.xlu0 %189 }
  0x83   :  { %183 = vst [vmem:[#allocation2 + $0x10] sm:$0xc] %v179_v51  ;;  %184 = vst [vmem:[#allocation2 + $0x18] sm:$0xc] %v180_v52  ;;  %v193_v55 = vsel %vm104_vm0, %v190_v54, %v192_v53  ;;  %v194_v56 = vsel %vm104_vm0, %v192_v53, %v190_v54 }
  0x84   :  { %v196_v57 = vsel %vm47_vm2, %v194_v56, 0.0  ;;  %v199_v58 = vrot.slane %v193_v55, 4 }
  0x85   :  { %v200_v59 = vrot.slane %v196_v57, 4 }
  0x86   :  { %203 = vst [vmem:[#allocation2 + $0x10] sm:$0x30] %v199_v58  ;;  %v128_v60 = vpop.permute.xlu1 %127  ;;  %v126_v61 = vpop.permute.xlu0 %125 }
  0x87   :  { %204 = vst [vmem:[#allocation2 + $0x18] sm:$0x30] %v200_v59  ;;  %v130_v62 = vsel %vm129_vm5, %v126_v61, %v128_v60  ;;  %v131_v63 = vsel %vm129_vm5, %v128_v60, %v126_v61 }
  0x88   :  { %v136_v0 = vsel %vm48_vm6, %v131_v63, 0.0  ;;  %v141_v1 = vrot.slane %v130_v62, 2 }
  0x89   :  { %v140_v2 = vrot.slane %v136_v0, 2 }
  0x8a   :  { %145 = vst [vmem:[#allocation2 + $0x8] sm:$0xc0] %v141_v1  ;;  %v212_v3 = vpop.permute.xlu1 %211  ;;  %v210_v4 = vpop.permute.xlu0 %209 }
  0x8b   :  { %144 = vst [vmem:[#allocation2] sm:$0xc0] %v140_v2  ;;  %v213_v5 = vsel %vm129_vm5, %v210_v4, %v212_v3  ;;  %v214_v6 = vsel %vm129_vm5, %v212_v3, %v210_v4 }
  0x8c   :  { %v215_v7 = vsel %vm48_vm6, %v214_v6, 0.0  ;;  %v220_v8 = vrot.slane %v213_v5, 2 }
  0x8d   :  { %v219_v9 = vrot.slane %v215_v7, 2 }
  0x8e   :  { %224 = vst [vmem:[#allocation2 + $0x18] sm:$0xc0] %v220_v8  ;;  %v57_v12 = vpop.permute.xlu1 %56  ;;  %v55_v13 = vpop.permute.xlu0 %54 }
  0x8f   :  { %223 = vst [vmem:[#allocation2 + $0x10] sm:$0xc0] %v219_v9  ;;  %v59_v14 = vsel %vm58_vm7, %v55_v13, %v57_v12  ;;  %v60_v15 = vsel %vm58_vm7, %v57_v12, %v55_v13 }
  0x90   :  { %v65_v16 = vsel %vm603_vm8, %v59_v14, 0.0  ;;  %v66_v17 = vsel %vm609_vm9, %v60_v15, 0.0 }
  0x91   :  { %67 = vst [vmem:[#allocation2] sm:$0x3] %v65_v16  ;;  %68 = vst [vmem:[#allocation2 + $0x8] sm:$0x3] %v66_v17 }
  0x92   :  { %v156_v18 = vpop.permute.xlu1 %155  ;;  %v154_v19 = vpop.permute.xlu0 %153 }
  0x93   :  { %v157_v20 = vsel %vm58_vm7, %v154_v19, %v156_v18  ;;  %v158_v21 = vsel %vm58_vm7, %v156_v18, %v154_v19 }
  0x94   :  { %v159_v22 = vsel %vm603_vm8, %v157_v20, 0.0  ;;  %v160_v23 = vsel %vm609_vm9, %v158_v21, 0.0 }
  0x95   :  { %161 = vst [vmem:[#allocation2 + $0x10] sm:$0x3] %v159_v22  ;;  %162 = vst [vmem:[#allocation2 + $0x18] sm:$0x3] %v160_v23 }
  0x98   :  { %v228_v27 = vld [vmem:[#allocation2 + $0x8] sm:$0xff]  ;;  %v227_v29 = vld [vmem:[#allocation2] sm:$0xff] }
  0x99   :  { %v432_v24 = vpack.c.bf16 %v232_v25, %v228_v27  ;;  %v435_v30 = vpack.c.bf16 %v231_v26, %v227_v29 }
  0x9b   :  { %434 = vmatprep.subr.msk.bf16.mxu0 %vm629_vm12, %v432_v24 }
  0x9c   :  { %437 = vmatpush1.bf16.msk.msra.mxu0 %vm629_vm12, %v435_v30  ;;  %v230_v33 = vld [vmem:[#allocation2 + $0x18] sm:$0xff]  ;;  %v229_v34 = vld [vmem:[#allocation2 + $0x10] sm:$0xff] }
  0x9d   :  { %v438_v36 = vpack.c.bf16 %v234_v31, %v230_v33  ;;  %v441_v37 = vpack.c.bf16 %v233_v32, %v229_v34 }
  0x9f   :  { %440 = vmatprep.subr.msk.bf16.mxu1 %vm629_vm12, %v438_v36  ;;  %428 = vmatmul.mubr.msk.f32.vlgmr.msra.gmra.mrb[0].mxu0 %vm242_vm13, %v235_v35 }
  0xa0   :  { %443 = vmatpush1.bf16.msk.msra.mxu1 %vm629_vm12, %v441_v37 }
  0xa3   :  { %431 = vmatmul.mubr.msk.f32.vlgmr.msra.gmra.mrb[0].mxu1 %vm242_vm13, %v235_v35  ;;  %v240_v38 = vpop.permute.xlu0 %239 }
 0x172   :  { %v325_v39 = vpop.f32.mrb[0].mxu0 }
 0x173   :  { %v326_v40 = vadd.f32 %v325_v39, %v240_v38  ;;  %v327_v41 = vpop.f32.mrb[1].mxu0 }
 0x174   :  { %v328_v42 = vadd.f32 %v327_v41, %v240_v38 }
 0x175   :  { %401 = vst [vmem:[#allocation3] sm:$0xff] %v326_v40 }
 0x176   :  { %402 = vst [vmem:[#allocation3 + $0x8] sm:$0xff] %v328_v42  ;;  %v396_v43 = vpop.f32.mrb[0].mxu1 }
 0x177   :  { %v397_v44 = vadd.f32 %v396_v43, %v240_v38  ;;  %v398_v45 = vpop.f32.mrb[1].mxu1 }
 0x178   :  { %v399_v46 = vadd.f32 %v398_v45, %v240_v38 }
 0x179   :  { %404 = vst [vmem:[#allocation3 + $0x10] sm:$0xff] %v397_v44 }
 0x17a   :  { %405 = vst [vmem:[#allocation3 + $0x18] sm:$0xff] %v399_v46 }
 0x17b   :  { %466 = shalt.err (!%p463_p4)
}
 0x17c   :  { %s467_s11 = scalar_lea.hbm %s659_s3, 512 }
 0x17d   :  { %p468_p5 = scmp.ne.s32.totalorder %s659_s3, %s467_s11  ;;  %p471_p6 = scmp.lt.u32.totalorder %s467_s11, %s659_s3 }
 0x17f   :  { %p473_p7 = pnand %p471_p6, %p468_p5 }
 0x181   :  { %476 = shalt.err (!%p473_p7)
}
 0x182   :  { %s487_s16 = smov 256   ;;  %s488_s17 = smov 16  }
 0x183   :  { %417 = dma.vmem_to_hbm [thread:$0]  %s412_s8, 512, %s659_s3, [#allocation4], %s487_s16, %s487_s16, %s488_s17  }
 0x184   :  { %477 = dma.done.wait [#allocation4], 512  }
 0x185   :  { %478 = vsyncadd [#allocation4], 4294966784 }
 0x186   :  { %421 = vsyncpa [#allocation4], 1 }

</bundles_post_ra>
